<compile_context>
chip_gen: v7x
topology: tpu7x:2x2x1
jax: 0.10.0
libtpu: 0.0.40
codegen_flags: <defaults>
</compile_context>

<pallas_src>
import jax
import jax.numpy as jnp
from jax.experimental import pallas as pl
from jax.experimental.pallas import tpu as pltpu


# ---------------------------------------------------------------------------
# Model hyper-parameters (small, consistent with the module's __init__)
# ---------------------------------------------------------------------------
VOCAB_SIZE = 32
EMB_DIM = 8
FILTER_NUM = 4
KERNEL_LST = (3, 3, 3)
BATCH = 2
SEQ_LEN = 16

K1, K2, K3 = KERNEL_LST
C1, C2, C3 = FILTER_NUM, 2 * FILTER_NUM, 3 * FILTER_NUM
L1 = SEQ_LEN - K1 + 1                  # per-batch rows after conv1
L2 = L1 - K2 + 1                       # after conv2
L3 = L2 - K3 + 1                       # after conv3

BL = BATCH * SEQ_LEN                   # fused row count of the token stream
N1 = BL - (K1 - 1)                     # fused conv1 output rows
N2 = N1 - (K2 - 1)                     # fused conv2 output rows
N3 = N2 - (K3 - 1)                     # fused conv3 output rows

# ---- packed parameter slab layout (rows x lanes = 176 x 12, f32) ----------
W1_ROWS = 128                          # 96 folded emb@w1 rows + bias row + pad
BIAS1_ROW = K1 * VOCAB_SIZE            # 96 (the always-one patch lane)
W2_ROW0 = 128                          # 8-aligned start
W2_ROWS = K2 * C1 + 1                  # 13 (12 weight rows + bias row)
W3_ROW0 = 144                          # 8-aligned start
W3_ROWS = K3 * C2 + 1                  # 25 (24 weight rows + bias row)
SLAB_ROWS = 176                        # multiple of 8, >= 144 + 25
SLAB_COLS = C3                         # 12 (widest C_out)

assert K1 * VOCAB_SIZE + 1 <= 128      # one-hot patches + bias lane fit 1 lane tile
assert BATCH * SEQ_LEN >= (BATCH - 1) * SEQ_LEN + L3 + (K2 - 1) + (K3 - 1)


# ---------------------------------------------------------------------------
# Pallas kernel: fused embedding+conv1, conv2, conv3 (im2col, batch-fused),
# ReLU, per-batch global max pool.  One invocation, no grid, 3 MXU matmuls.
# ---------------------------------------------------------------------------
def _sequence_net_kernel(tok_ref, slab_ref, o_ref):
    tok = tok_ref[...]                                         # (BL, 1) int32

    # --- conv1 fused with embedding gather -------------------------------
    # patches1[i, k*V + v] = 1 iff tok[i+k] == v ; lane BIAS1_ROW is always 1.
    # (Out-of-range token ids would map to an all-zero row — tokens are
    #  guaranteed in [0, VOCAB_SIZE) here, matching nn.Embedding semantics.)
    lane = jax.lax.broadcasted_iota(jnp.int32, (N1, 128), 1)
    onehot = lane == BIAS1_ROW                                 # bias lane
    for k in range(K1):
        onehot = onehot | (lane == tok[k:k + N1, :] + k * VOCAB_SIZE)
    patches1 = onehot.astype(jnp.float32)                      # (N1, 128)

    w1a = slab_ref[0:W1_ROWS, 0:C1]                            # (128, C1)
    y1 = jnp.maximum(
        jnp.dot(patches1, w1a, preferred_element_type=jnp.float32), 0.0)

    # --- conv2 (im2col over the fused batch, bias = constant-1 lane) ------
    patches2 = jnp.concatenate(
        [y1[k:k + N2, :] for k in range(K2)] + [jnp.ones((N2, 1), jnp.float32)],
        axis=-1)                                               # (N2, K2*C1 + 1)
    w2a = slab_ref[W2_ROW0:W2_ROW0 + W2_ROWS, 0:C2]            # (13, C2)
    y2 = jnp.maximum(
        jnp.dot(patches2, w2a, preferred_element_type=jnp.float32), 0.0)

    # --- conv3 -------------------------------------------------------------
    patches3 = jnp.concatenate(
        [y2[k:k + N3, :] for k in range(K3)] + [jnp.ones((N3, 1), jnp.float32)],
        axis=-1)                                               # (N3, K3*C2 + 1)
    w3a = slab_ref[W3_ROW0:W3_ROW0 + W3_ROWS, 0:C3]            # (25, C3)
    y3 = jnp.maximum(
        jnp.dot(patches3, w3a, preferred_element_type=jnp.float32), 0.0)

    # --- AdaptiveMaxPool1d(1): per-batch max over the VALID fused rows -----
    # Boundary-straddling rows (finite garbage) are never inside these slices;
    # slice starts (b*16) stay 8-sublane aligned.
    pooled = [
        jnp.max(y3[b * SEQ_LEN:b * SEQ_LEN + L3, :], axis=0, keepdims=True)
        for b in range(BATCH)
    ]
    o_ref[...] = jnp.concatenate(pooled, axis=0)               # single (B, C3) store


# ---------------------------------------------------------------------------
# Wrapper: pack all parameters into one slab (done once), then one pallas_call
# with exactly two operands (tokens + slab).
# ---------------------------------------------------------------------------
def pack_params(params):
    """Build the (SLAB_ROWS, SLAB_COLS) f32 parameter slab."""
    emb, w1, b1, w2, b2, w3, b3 = params
    hi = jax.lax.Precision.HIGHEST
    # Fold embedding into conv1: row k*V + v holds emb[v] @ w1[k]  -> (96, C1)
    w1p = jnp.concatenate(
        [jnp.dot(emb, w1[k], precision=hi) for k in range(K1)], axis=0)
    slab = jnp.zeros((SLAB_ROWS, SLAB_COLS), jnp.float32)
    slab = slab.at[0:K1 * VOCAB_SIZE, 0:C1].set(w1p)
    slab = slab.at[BIAS1_ROW, 0:C1].set(b1.reshape(C1))
    slab = slab.at[W2_ROW0:W2_ROW0 + K2 * C1, 0:C2].set(w2.reshape(K2 * C1, C2))
    slab = slab.at[W2_ROW0 + K2 * C1, 0:C2].set(b2.reshape(C2))
    slab = slab.at[W3_ROW0:W3_ROW0 + K3 * C2, 0:C3].set(w3.reshape(K3 * C2, C3))
    slab = slab.at[W3_ROW0 + K3 * C2, 0:C3].set(b3.reshape(C3))
    return slab


@jax.jit
def sequence_net_forward(tokens, slab):
    """tokens: (B, L) int. slab: packed params. Returns (B, 3*filter_num) f32."""
    tok2d = tokens.astype(jnp.int32).reshape(BL, 1)
    vmem = pl.BlockSpec(memory_space=pltpu.MemorySpace.VMEM)
    return pl.pallas_call(
        _sequence_net_kernel,
        out_shape=jax.ShapeDtypeStruct((BATCH, C3), jnp.float32),
        in_specs=[vmem, vmem],
        out_specs=vmem,
    )(tok2d, slab)


# ---------------------------------------------------------------------------
# Deterministic parameter init (shapes from the module's __init__)
# ---------------------------------------------------------------------------
def init_params(key):
    ks = jax.random.split(key, 7)
    emb = jax.random.normal(ks[0], (VOCAB_SIZE, EMB_DIM), jnp.float32)
    # conv weights stored as (K, C_in, C_out) (= PyTorch (C_out, C_in, K) transposed)
    w1 = jax.random.normal(ks[1], (K1, EMB_DIM, C1), jnp.float32) * 0.2
    b1 = jax.random.normal(ks[2], (1, C1), jnp.float32) * 0.1
    w2 = jax.random.normal(ks[3], (K2, C1, C2), jnp.float32) * 0.2
    b2 = jax.random.normal(ks[4], (1, C2), jnp.float32) * 0.1
    w3 = jax.random.normal(ks[5], (K3, C2, C3), jnp.float32) * 0.2
    b3 = jax.random.normal(ks[6], (1, C3), jnp.float32) * 0.1
    return emb, w1, b1, w2, b2, w3, b3


# Pure-JAX reference (mirrors the PyTorch forward exactly) for a sanity check.
def reference_forward(tokens, params):
    emb, w1, b1, w2, b2, w3, b3 = params
    hi = jax.lax.Precision.HIGHEST
    x = jnp.take(emb, tokens.astype(jnp.int32), axis=0)        # (B, L, E)

    def conv_relu(x_in, w, b, k):
        l_out = x_in.shape[1] - k + 1
        acc = jnp.zeros((x_in.shape[0], l_out, w.shape[-1]), jnp.float32)
        for kk in range(k):
            acc += jnp.einsum('ble,eo->blo', x_in[:, kk:kk + l_out, :], w[kk],
                              precision=hi)
        return jnp.maximum(acc + b[0], 0.0)

    y = conv_relu(x, w1, b1, K1)
    y = conv_relu(y, w2, b2, K2)
    y = conv_relu(y, w3, b3, K3)
    return jnp.max(y, axis=1)                                  # (B, 3F)


if __name__ == "__main__":
    key = jax.random.PRNGKey(0)
    k_param, k_tok = jax.random.split(key)
    params = init_params(k_param)
    tokens = jax.random.randint(k_tok, (BATCH, SEQ_LEN), 0, VOCAB_SIZE,
                                dtype=jnp.int32)

    slab = jax.block_until_ready(pack_params(params))          # one-time pack
    out = jax.block_until_ready(sequence_net_forward(tokens, slab))

    ref = jax.block_until_ready(reference_forward(tokens, params))
    assert out.shape == (BATCH, 3 * FILTER_NUM)
    assert jnp.allclose(out, ref, atol=1e-5, rtol=1e-5)

    print("KERNEL_OK")
</pallas_src>

<mosaic_0001>
module attributes {stable_mosaic.version = 11 : i64} {
  func.func @_sequence_net_kernel(%arg0: memref<32x1xi32, #tpu.memory_space<vmem>>, %arg1: memref<176x12xf32, #tpu.memory_space<vmem>>, %arg2: memref<2x12xf32, #tpu.memory_space<vmem>>) attributes {dimension_semantics = [], scalar_prefetch = 0 : i64, scratch_operands = 0 : i64, tpu.core_type = #tpu.core_type<tc>} {
    %c0 = arith.constant 0 : index
    %c0_0 = arith.constant 0 : index
    %0 = vector.load %arg0[%c0, %c0_0] : memref<32x1xi32, #tpu.memory_space<vmem>>, vector<32x1xi32>
    %1 = tpu.iota {dimensions = array<i32: 1>} : vector<30x128xi32>
    %c96_i32 = arith.constant 96 : i32
    %2 = vector.broadcast %c96_i32 : i32 to vector<30x128xi32>
    %3 = arith.cmpi eq, %1, %2 : vector<30x128xi32>
    %4 = vector.extract_strided_slice %0 {offsets = [0, 0], sizes = [30, 1], strides = [1, 1]} : vector<32x1xi32> to vector<30x1xi32>
    %c0_i32 = arith.constant 0 : i32
    %5 = vector.broadcast %c0_i32 : i32 to vector<30x1xi32>
    %6 = arith.addi %4, %5 : vector<30x1xi32>
    %7 = vector.broadcast %6 : vector<30x1xi32> to vector<30x128xi32>
    %8 = arith.cmpi eq, %1, %7 : vector<30x128xi32>
    %9 = arith.ori %3, %8 : vector<30x128xi1>
    %10 = vector.extract_strided_slice %0 {offsets = [1, 0], sizes = [30, 1], strides = [1, 1]} : vector<32x1xi32> to vector<30x1xi32>
    %c32_i32 = arith.constant 32 : i32
    %11 = vector.broadcast %c32_i32 : i32 to vector<30x1xi32>
    %12 = arith.addi %10, %11 : vector<30x1xi32>
    %13 = vector.broadcast %12 : vector<30x1xi32> to vector<30x128xi32>
    %14 = arith.cmpi eq, %1, %13 : vector<30x128xi32>
    %15 = arith.ori %9, %14 : vector<30x128xi1>
    %16 = vector.extract_strided_slice %0 {offsets = [2, 0], sizes = [30, 1], strides = [1, 1]} : vector<32x1xi32> to vector<30x1xi32>
    %c64_i32 = arith.constant 64 : i32
    %17 = vector.broadcast %c64_i32 : i32 to vector<30x1xi32>
    %18 = arith.addi %16, %17 : vector<30x1xi32>
    %19 = vector.broadcast %18 : vector<30x1xi32> to vector<30x128xi32>
    %20 = arith.cmpi eq, %1, %19 : vector<30x128xi32>
    %21 = arith.ori %15, %20 : vector<30x128xi1>
    %22 = arith.extui %21 : vector<30x128xi1> to vector<30x128xi32>
    %23 = arith.sitofp %22 : vector<30x128xi32> to vector<30x128xf32>
    %c0_1 = arith.constant 0 : index
    %c0_2 = arith.constant 0 : index
    %24 = vector.load %arg1[%c0_1, %c0_2] : memref<176x12xf32, #tpu.memory_space<vmem>>, vector<128x4xf32>
    %cst = arith.constant dense<0.000000e+00> : vector<30x4xf32>
    %25 = tpu.matmul %23, %24, %cst {dimension_numbers = #tpu.dot_dimension_numbers<[1], [0], [0], [1], [0, 0, 1, 1], [], []>} : vector<30x128xf32>, vector<128x4xf32>, vector<30x4xf32> -> vector<30x4xf32>
    %cst_3 = arith.constant 0.000000e+00 : f32
    %26 = vector.broadcast %cst_3 : f32 to vector<30x4xf32>
    %27 = arith.maximumf %25, %26 : vector<30x4xf32>
    %28 = vector.extract_strided_slice %27 {offsets = [0, 0], sizes = [28, 4], strides = [1, 1]} : vector<30x4xf32> to vector<28x4xf32>
    %29 = vector.extract_strided_slice %27 {offsets = [1, 0], sizes = [28, 4], strides = [1, 1]} : vector<30x4xf32> to vector<28x4xf32>
    %30 = vector.extract_strided_slice %27 {offsets = [2, 0], sizes = [28, 4], strides = [1, 1]} : vector<30x4xf32> to vector<28x4xf32>
    %cst_4 = arith.constant 1.000000e+00 : f32
    %31 = vector.broadcast %cst_4 : f32 to vector<28x1xf32>
    %32 = tpu.concatenate %28, %29, %30, %31 in 1 : vector<28x4xf32>, vector<28x4xf32>, vector<28x4xf32>, vector<28x1xf32> -> vector<28x13xf32>
    %c128 = arith.constant 128 : index
    %c0_5 = arith.constant 0 : index
    %33 = vector.load %arg1[%c128, %c0_5] : memref<176x12xf32, #tpu.memory_space<vmem>>, vector<13x8xf32>
    %cst_6 = arith.constant dense<0.000000e+00> : vector<28x8xf32>
    %34 = tpu.matmul %32, %33, %cst_6 {dimension_numbers = #tpu.dot_dimension_numbers<[1], [0], [0], [1], [0, 0, 1, 1], [], []>} : vector<28x13xf32>, vector<13x8xf32>, vector<28x8xf32> -> vector<28x8xf32>
    %cst_7 = arith.constant 0.000000e+00 : f32
    %35 = vector.broadcast %cst_7 : f32 to vector<28x8xf32>
    %36 = arith.maximumf %34, %35 : vector<28x8xf32>
    %37 = vector.extract_strided_slice %36 {offsets = [0, 0], sizes = [26, 8], strides = [1, 1]} : vector<28x8xf32> to vector<26x8xf32>
    %38 = vector.extract_strided_slice %36 {offsets = [1, 0], sizes = [26, 8], strides = [1, 1]} : vector<28x8xf32> to vector<26x8xf32>
    %39 = vector.extract_strided_slice %36 {offsets = [2, 0], sizes = [26, 8], strides = [1, 1]} : vector<28x8xf32> to vector<26x8xf32>
    %cst_8 = arith.constant 1.000000e+00 : f32
    %40 = vector.broadcast %cst_8 : f32 to vector<26x1xf32>
    %41 = tpu.concatenate %37, %38, %39, %40 in 1 : vector<26x8xf32>, vector<26x8xf32>, vector<26x8xf32>, vector<26x1xf32> -> vector<26x25xf32>
    %c144 = arith.constant 144 : index
    %c0_9 = arith.constant 0 : index
    %42 = vector.load %arg1[%c144, %c0_9] : memref<176x12xf32, #tpu.memory_space<vmem>>, vector<25x12xf32>
    %cst_10 = arith.constant dense<0.000000e+00> : vector<26x12xf32>
    %43 = tpu.matmul %41, %42, %cst_10 {dimension_numbers = #tpu.dot_dimension_numbers<[1], [0], [0], [1], [0, 0, 1, 1], [], []>} : vector<26x25xf32>, vector<25x12xf32>, vector<26x12xf32> -> vector<26x12xf32>
    %cst_11 = arith.constant 0.000000e+00 : f32
    %44 = vector.broadcast %cst_11 : f32 to vector<26x12xf32>
    %45 = arith.maximumf %43, %44 : vector<26x12xf32>
    %46 = vector.extract_strided_slice %45 {offsets = [0, 0], sizes = [10, 12], strides = [1, 1]} : vector<26x12xf32> to vector<10x12xf32>
    %cst_12 = arith.constant dense<0xFF800000> : vector<12xf32>
    %47 = vector.multi_reduction <maximumf>, %46, %cst_12 [0] : vector<10x12xf32> to vector<12xf32>
    %48 = vector.shape_cast %47 : vector<12xf32> to vector<1x12xf32>
    %49 = vector.extract_strided_slice %45 {offsets = [16, 0], sizes = [10, 12], strides = [1, 1]} : vector<26x12xf32> to vector<10x12xf32>
    %cst_13 = arith.constant dense<0xFF800000> : vector<12xf32>
    %50 = vector.multi_reduction <maximumf>, %49, %cst_13 [0] : vector<10x12xf32> to vector<12xf32>
    %51 = vector.shape_cast %50 : vector<12xf32> to vector<1x12xf32>
    %52 = tpu.concatenate %48, %51 in 0 : vector<1x12xf32>, vector<1x12xf32> -> vector<2x12xf32>
    %c0_14 = arith.constant 0 : index
    %c0_15 = arith.constant 0 : index
    %53 = vector.load %arg2[%c0_14, %c0_15] : memref<2x12xf32, #tpu.memory_space<vmem>>, vector<2x12xf32>
    tpu.vector_store %arg2[%c0_14, %c0_15], %52 {strides = array<i32>} : memref<2x12xf32, #tpu.memory_space<vmem>>, vector<2x12xf32>,
    return
  }
}

</mosaic_0001>

<bundles_post_ra>
// kernel: sequence_net_forward.1
= control target key start
LH: loop header
LB: loop body
LE: loop exit
PB: predicated region body
PF: predicated region fallthrough
CT: control target
= control target key end

     0   :  { %v793_v3 = vmov 0   ;;  %s1005_s0 = inlined_call_operand.vmem [shape: s32[32,1], index: 0, kind: input, shape index: {}]   ;;  %s1006_s1 = inlined_call_operand.vmem [shape: f32[176,12], index: 1, kind: input, shape index: {}]   ;;  %s1007_s2 = inlined_call_operand.hbm [shape: f32[2,12], index: 2, kind: output, shape index: {}]  }
   0x1   :  { %v14_v0 = vld [vmem:[%s1005_s0 + $0x10] sm:$0xff]  ;;  %v12_v1 = vld [vmem:[%s1005_s0] sm:$0xff]  ;;  %v13_v2 = vld [vmem:[%s1005_s0 + $0x8] sm:$0xff]  ;;  %768 = vset.pattern.permute.xlu1 %v793_v3  ;;  %767 = vset.pattern.permute.xlu0 %v793_v3 }
   0x2   :  { %v41_v4 = vadd.s32 32, %v14_v0  ;;  %v39_v5 = vadd.s32 32, %v12_v1  ;;  %v127_v6 = vld [vmem:[%s1006_s1] sm:$0xff]  ;;  %v128_v7 = vld [vmem:[%s1006_s1 + $0x8] sm:$0xff]  ;;  %v129_v8 = vld [vmem:[%s1006_s1 + $0x10] sm:$0xff]  ;;  %v79_v9 = vadd.s32 64, %v12_v1 }
   0x3   :  { %v40_v10 = vadd.s32 32, %v13_v2  ;;  %v712_v11 = vpack.c.bf16 %v128_v7, %v127_v6  ;;  %v130_v12 = vld [vmem:[%s1006_s1 + $0x18] sm:$0xff]  ;;  %v131_v14 = vld [vmem:[%s1006_s1 + $0x20] sm:$0xff]  ;;  %v132_v15 = vld [vmem:[%s1006_s1 + $0x28] sm:$0xff] }
   0x4   :  { %50 = vperm.xlu1 %768, %v41_v4   ;;  %44 = vperm.xlu0 %767, %v39_v5   ;;  %v716_v13 = vpack.c.bf16 %v130_v12, %v129_v8 }
   0x5   :  { %713 = vmatprep.subr.bf16.mxu0 %v712_v11 }
   0x6   :  { %7 = vsyncpa [#allocation3], 0  ;;  %715 = vmatpush3.bf16.msra.mxu0 %v712_v11  ;;  %v81_v16 = vadd.s32 64, %v14_v0  ;;  %v80_v17 = vadd.s32 64, %v13_v2  ;;  %v15_v18 = vld [vmem:[%s1005_s0 + $0x18] sm:$0xff]  ;;  %v720_v19 = vpack.c.bf16 %v132_v15, %v131_v14  ;;  %v133_v20 = vld [vmem:[%s1006_s1 + $0x30] sm:$0xff]  ;;  %v16_v37 = vlaneseq }
   0x7   :  { %717 = vmatprep.subr.bf16.mxu0 %v716_v13  ;;  %v134_v21 = vld [vmem:[%s1006_s1 + $0x38] sm:$0xff]  ;;  %v42_v22 = vadd.s32 32, %v15_v18  ;;  %v135_v24 = vld [vmem:[%s1006_s1 + $0x40] sm:$0xff]  ;;  %v136_v25 = vld [vmem:[%s1006_s1 + $0x48] sm:$0xff]  ;;  %v82_v26 = vadd.s32 64, %v15_v18  ;;  %vm63_vm4 = vcmask 1046528  }
   0x8   :  { %84 = vperm.xlu1 %768, %v79_v9   ;;  %47 = vperm.xlu0 %767, %v40_v10   ;;  %v724_v23 = vpack.c.bf16 %v134_v21, %v133_v20  ;;  %v728_v27 = vpack.c.bf16 %v136_v25, %v135_v24  ;;  %v137_v28 = vld [vmem:[%s1006_s1 + $0x50] sm:$0xff]  ;;  %v138_v29 = vld [vmem:[%s1006_s1 + $0x58] sm:$0xff]  ;;  %v139_v31 = vld [vmem:[%s1006_s1 + $0x60] sm:$0xff]  ;;  %v877_v38 = vand.u32 127, %v16_v37  ;;  %vm103_vm7 = vcmask 1045504   ;;  %s796_s24 = smov 4  }
   0x9   :  { %v732_v30 = vpack.c.bf16 %v138_v29, %v137_v28  ;;  %v140_v32 = vld [vmem:[%s1006_s1 + $0x68] sm:$0xff]  ;;  %v141_v34 = vld [vmem:[%s1006_s1 + $0x70] sm:$0xff]  ;;  %v142_v35 = vld [vmem:[%s1006_s1 + $0x78] sm:$0xff]  ;;  %v794_v4 = vmov 1.0   ;;  %s797_s25 = smov 8   ;;  %s799_s6 = smov [#allocation2]  }
   0xa   :  { %719 = vmatpush3.bf16.msra.mxu0 %v716_v13  ;;  %v736_v33 = vpack.c.bf16 %v140_v32, %v139_v31  ;;  %v740_v36 = vpack.c.bf16 %v142_v35, %v141_v34  ;;  %vm18_vm8 = vcmp.eq.s32.totalorder %v877_v38, 96  ;;  %v289_v15 = vld [vmem:[%s1006_s1 + $0x80] sm:$0xff]  ;;  %s590_s0 = sshll.u32 %s799_s6, 4  ;;  %s591_s0 = int_to_ptr.vmem [resolvable:$true] %s590_s0 }
   0xb   :  { %721 = vmatprep.subr.bf16.mxu0 %v720_v19  ;;  %s769_s7 = scalar_lea.vmem %s591_s0, 32  ;;  %p774_p1 = scmp.lt.s32.totalorder %s591_s0, %s591_s0 }
   0xc   :  { %90 = vperm.xlu1 %768, %v81_v16   ;;  %87 = vperm.xlu0 %767, %v80_v17   ;;  %v290_v16 = vld [vmem:[%s1006_s1 + $0x88] sm:$0x1f]  ;;  %p770_p0 = scmp.ne.s32.totalorder %s591_s0, %s769_s7  ;;  %p775_p2 = scmp.lt.s32.totalorder %s769_s7, %s769_s7 }
   0xe   :  { %723 = vmatpush3.bf16.msra.mxu0 %v720_v19  ;;  %p776_p3 = por %p775_p2, %p774_p1 }
   0xf   :  { %725 = vmatprep.subr.bf16.mxu0 %v724_v23 }
  0x10   :  { %53 = vperm.xlu1 %768, %v42_v22   ;;  %20 = vperm.xlu0 %767, %v12_v1   ;;  %p777_p4 = pnand %p776_p3, %p770_p0 }
  0x12   :  { %727 = vmatpush3.bf16.msra.mxu0 %v724_v23 }
  0x13   :  { %729 = vmatprep.subr.bf16.mxu0 %v728_v27 }
  0x14   :  { %93 = vperm.xlu1 %768, %v82_v26   ;;  %23 = vperm.xlu0 %767, %v13_v2  }
  0x16   :  { %731 = vmatpush3.bf16.msra.mxu0 %v728_v27 }
  0x17   :  { %733 = vmatprep.subr.bf16.mxu0 %v732_v30 }
  0x18   :  { %29 = vperm.xlu1 %768, %v15_v18   ;;  %26 = vperm.xlu0 %767, %v14_v0   ;;  %v744_v18 = vpack.c.bf16 %v290_v16, %v289_v15 }
  0x1a   :  { %735 = vmatpush3.bf16.msra.mxu0 %v732_v30 }
  0x1b   :  { %737 = vmatprep.subr.bf16.mxu0 %v736_v33 }
  0x1e   :  { %739 = vmatpush3.bf16.msra.mxu0 %v736_v33 }
  0x1f   :  { %741 = vmatprep.subr.bf16.mxu0 %v740_v36 }
  0x22   :  { %743 = vmatpush3.bf16.msra.mxu0 %v740_v36 }
  0x83   :  { %v51_v39 = vpop.permute.xlu1 %50  ;;  %v45_v40 = vpop.permute.xlu0 %44 }
  0x84   :  { %vm55_vm0 = vcmp.eq.s32.totalorder %v877_v38, %v45_v40  ;;  %vm57_vm3 = vcmp.eq.s32.totalorder %v877_v38, %v51_v39 }
  0x85   :  { %v59_v43 = vsel %vm55_vm0, 1, %v793_v3  ;;  %v61_v50 = vsel %vm57_vm3, 1, %v793_v3 }
  0x86   :  { %v64_v49 = vrot.slane %v59_v43, 1  ;;  %v67_v59 = vrot.slane %v61_v50, 1 }
  0x87   :  { %v85_v41 = vpop.permute.xlu1 %84  ;;  %v48_v42 = vpop.permute.xlu0 %47 }
  0x88   :  { %vm95_vm1 = vcmp.eq.s32.totalorder %v877_v38, %v85_v41  ;;  %vm56_vm2 = vcmp.eq.s32.totalorder %v877_v38, %v48_v42 }
  0x89   :  { %v60_v44 = vsel %vm56_vm2, 1, %v793_v3  ;;  %v99_v46 = vsel %vm95_vm1, 1, %v793_v3 }
  0x8a   :  { %v65_v45 = vrot.slane %v60_v44, 1  ;;  %v104_v53 = vrot.slane %v99_v46, 2 }
  0x8b   :  { %v91_v47 = vpop.permute.xlu1 %90  ;;  %v88_v48 = vpop.permute.xlu0 %87 }
  0x8c   :  { %vm97_vm5 = vcmp.eq.s32.totalorder %v877_v38, %v91_v47  ;;  %vm96_vm6 = vcmp.eq.s32.totalorder %v877_v38, %v88_v48  ;;  %v66_v55 = vsel %vm63_vm4, %v64_v49, %v65_v45  ;;  %v68_v62 = vsel %vm63_vm4, %v65_v45, %v67_v59 }
  0x8d   :  { %v101_v51 = vsel %vm97_vm5, 1, %v793_v3  ;;  %v100_v52 = vsel %vm96_vm6, 1, %v793_v3  ;;  %vm71_vm12 = vcmp.ne.s32.totalorder %v66_v55, 0  ;;  %vm72_vm2 = vcmp.ne.s32.totalorder %v68_v62, 0  ;;  %v453_v55 = vld [vmem:[%s1006_s1 + $0x90] sm:$0xff] }
  0x8e   :  { %v105_v54 = vrot.slane %v100_v52, 2  ;;  %v107_v56 = vrot.slane %v101_v51, 2 }
  0x8f   :  { %v54_v57 = vpop.permute.xlu1 %53  ;;  %v21_v58 = vpop.permute.xlu0 %20 }
  0x90   :  { %vm58_vm9 = vcmp.eq.s32.totalorder %v877_v38, %v54_v57  ;;  %vm31_vm10 = vcmp.eq.s32.totalorder %v877_v38, %v21_v58  ;;  %v106_v60 = vsel %vm103_vm7, %v104_v53, %v105_v54  ;;  %v108_v1 = vsel %vm103_vm7, %v105_v54, %v107_v56 }
  0x91   :  { %v62_v61 = vsel %vm58_vm9, 1, %v793_v3  ;;  %vm35_vm11 = vmor %vm18_vm8, %vm31_vm10  ;;  %vm111_vm13 = vcmp.ne.s32.totalorder %v106_v60, 0  ;;  %vm112_vm6 = vcmp.ne.s32.totalorder %v108_v1, 0  ;;  %v456_v60 = vld [vmem:[%s1006_s1 + $0xa8] sm:$0x1] }
  0x92   :  { %vm75_vm14 = vmor %vm35_vm11, %vm71_vm12  ;;  %v69_v2 = vrot.slane %v62_v61, 1 }
  0x93   :  { %v94_v63 = vpop.permute.xlu1 %93  ;;  %v24_v0 = vpop.permute.xlu0 %23  ;;  %vm115_vm15 = vmor %vm75_vm14, %vm111_vm13 }
  0x94   :  { %vm98_vm0 = vcmp.eq.s32.totalorder %v877_v38, %v94_v63  ;;  %vm32_vm1 = vcmp.eq.s32.totalorder %v877_v38, %v24_v0  ;;  %682 = vmatprep.mubr.msk.f32.mxu0 %vm115_vm15, %v794_v4  ;;  %v70_v9 = vsel %vm63_vm4, %v67_v59, %v69_v2  ;;  %vm74_vm12 = vcmp.ne.s32.totalorder %v69_v2, 0  ;;  %v455_v59 = vld [vmem:[%s1006_s1 + $0xa0] sm:$0xff] }
  0x95   :  { %v102_v5 = vsel %vm98_vm0, 1, %v793_v3  ;;  %vm36_vm3 = vmor %vm18_vm8, %vm32_vm1  ;;  %vm73_vm0 = vcmp.ne.s32.totalorder %v70_v9, 0  ;;  %v754_v63 = vpack.c.bf16 %v456_v60, %v455_v59 }
  0x96   :  { %v109_v6 = vrot.slane %v102_v5, 2  ;;  %vm76_vm5 = vmor %vm36_vm3, %vm72_vm2 }
  0x97   :  { %v30_v7 = vpop.permute.xlu1 %29  ;;  %v27_v8 = vpop.permute.xlu0 %26  ;;  %vm116_vm9 = vmor %vm76_vm5, %vm112_vm6 }
  0x98   :  { %vm34_vm10 = vcmp.eq.s32.totalorder %v877_v38, %v30_v7  ;;  %vm33_vm11 = vcmp.eq.s32.totalorder %v877_v38, %v27_v8  ;;  %683 = vmatmul.mubr.msk.f32.vlgmr.msra.gmra.mrb[0].mxu0 %vm116_vm9, %v794_v4  ;;  %v110_v10 = vsel %vm103_vm7, %v107_v56, %v109_v6  ;;  %vm114_vm3 = vcmp.ne.s32.totalorder %v109_v6, 0  ;;  %v454_v56 = vld [vmem:[%s1006_s1 + $0x98] sm:$0xff]  ;;  %s798_s1 = smov 16  }
  0x99   :  { %vm38_vm13 = vmor %vm18_vm8, %vm34_vm10  ;;  %vm113_vm15 = vcmp.ne.s32.totalorder %v110_v10, 0  ;;  %vm795_vm9 = vmmov 1   ;;  %v750_v57 = vpack.c.bf16 %v454_v56, %v453_v55 }
  0x9a   :  { %vm78_vm14 = vmor %vm38_vm13, %vm74_vm12  ;;  %vm279_vm12 = vcmask 64512   ;;  %vm284_vm13 = vcmask 97280  }
  0x9b   :  { %vm37_vm1 = vmor %vm18_vm8, %vm33_vm11  ;;  %vm304_vm8 = vcmask 1044480   ;;  %vm274_vm11 = vcmask 31744  }
  0x9c   :  { %vm77_vm2 = vmor %vm37_vm1, %vm73_vm0  ;;  %vm443_vm1 = vcmask 130048  }
  0x9d   :  { %vm117_vm5 = vmor %vm77_vm2, %vm113_vm15  ;;  %vm470_vm15 = vcmask 1040384   ;;  %vm448_vm2 = vcmask 195584  }
  0x9e   :  { %685 = vmatprep.mubr.msk.f32.mxu0 %vm117_vm5, %v794_v4  ;;  %vm118_vm6 = vmor %vm78_vm14, %vm114_vm3  ;;  %vm291_vm14 = vcmask 105472   ;;  %vm457_vm3 = vcmask 203776  }
  0x9f   :  { %686 = vmatmul.mubr.msk.f32.gmra.mrb[2].mxu0 %vm118_vm6, %v794_v4  ;;  %vm745_vm10 = vmpackc.low %vm304_vm8, %vm795_vm9 }
  0xa0   :  { %746 = vmatprep.subr.msk.bf16.mxu1 %vm745_vm10, %v744_v18  ;;  %vm755_vm0 = vmpackc.low %vm470_vm15, %vm795_vm9 }
  0xa1   :  { %749 = vmatpush3.bf16.msk.msra.mxu1 %vm745_vm10, %v744_v18 }
  0xa2   :  { %751 = vmatprep.subr.bf16.mxu1 %v750_v57 }
 0x16b   :  { %v684_v3 = vpop.f32.mrb[0].mxu0 }
 0x16c   :  { %v229_v11 = vmax.f32 %v684_v3, 0.0  ;;  %v209_v12 = vpop.f32.mrb[1].mxu0 }
 0x16d   :  { %v228_v13 = vmax.f32 %v209_v12, 0.0 }
 0x16e   :  { %v237_v14 = vrot.slane %v229_v11, 1  ;;  %v256_v19 = vrot.slane %v229_v11, 2 }
 0x16f   :  { %v236_v17 = vrot.slane %v228_v13, 1  ;;  %v255_v20 = vrot.slane %v228_v13, 2 }
 0x171   :  { %v238_v21 = vsel %vm63_vm4, %v236_v17, %v237_v14  ;;  %v257_v27 = vsel %vm103_vm7, %v255_v20, %v256_v19 }
 0x172   :  { %v687_v22 = vpop.f32.mrb[2].mxu0  ;;  %243 = vrot.lane.b32.xlu0 %v238_v21, %s796_s24 }
 0x173   :  { %v231_v23 = vmax.f32 %v687_v22, 0.0  ;;  %v219_v24 = vpop.f32.mrb[3].mxu0 }
 0x174   :  { %v230_v25 = vmax.f32 %v219_v24, 0.0 }
 0x175   :  { %v241_v26 = vrot.slane %v231_v23, 1  ;;  %v260_v29 = vrot.slane %v231_v23, 2 }
 0x176   :  { %v239_v28 = vrot.slane %v230_v25, 1  ;;  %262 = vrot.lane.b32.xlu0 %v257_v27, %s797_s25  ;;  %v258_v30 = vrot.slane %v230_v25, 2 }
 0x177   :  { %249 = vrot.lane.b32.xlu1 %v241_v26, %s796_s24 }
 0x178   :  { %v242_v31 = vsel %vm63_vm4, %v239_v28, %v241_v26  ;;  %v240_v32 = vsel %vm63_vm4, %v237_v14, %v239_v28  ;;  %v261_v33 = vsel %vm103_vm7, %v258_v30, %v260_v29  ;;  %v259_v34 = vsel %vm103_vm7, %v256_v19, %v258_v30 }
 0x17a   :  { %247 = vrot.lane.b32.xlu0 %v242_v31, %s796_s24 }
 0x17b   :  { %245 = vrot.lane.b32.xlu1 %v240_v32, %s796_s24 }
 0x17e   :  { %266 = vrot.lane.b32.xlu0 %v261_v33, %s797_s25 }
 0x17f   :  { %264 = vrot.lane.b32.xlu1 %v259_v34, %s797_s25 }
 0x183   :  { %268 = vrot.lane.b32.xlu1 %v260_v29, %s797_s25 }
 0x1e4   :  { %v244_v35 = vpop.permute.xlu0 %243 }
 0x1e5   :  { %v275_v36 = vsel %vm274_vm11, %v228_v13, %v244_v35 }
 0x1e8   :  { %v263_v37 = vpop.permute.xlu0 %262 }
 0x1e9   :  { %v250_v38 = vpop.permute.xlu1 %249  ;;  %v280_v39 = vsel %vm279_vm12, %v275_v36, %v263_v37 }
 0x1ea   :  { %v285_v40 = vsel %vm284_vm13, %v280_v39, 1.0  ;;  %v278_v51 = vsel %vm274_vm11, %v231_v23, %v250_v38 }
 0x1eb   :  { %692 = vmatprep.mubr.msk.f32.mxu1 %vm291_vm14, %v285_v40 }
 0x1ec   :  { %v248_v41 = vpop.permute.xlu0 %247 }
 0x1ed   :  { %v246_v42 = vpop.permute.xlu1 %245  ;;  %v277_v43 = vsel %vm274_vm11, %v230_v25, %v248_v41 }
 0x1ee   :  { %v276_v45 = vsel %vm274_vm11, %v229_v11, %v246_v42 }
 0x1f0   :  { %v267_v44 = vpop.permute.xlu0 %266 }
 0x1f1   :  { %v265_v46 = vpop.permute.xlu1 %264  ;;  %v282_v47 = vsel %vm279_vm12, %v277_v43, %v267_v44 }
 0x1f2   :  { %v281_v48 = vsel %vm279_vm12, %v276_v45, %v265_v46  ;;  %v287_v49 = vsel %vm284_vm13, %v282_v47, 1.0 }
 0x1f3   :  { %v286_v50 = vsel %vm284_vm13, %v281_v48, 1.0 }
 0x1f4   :  { %693 = vmatmul.mubr.msk.f32.vlgmr.msra.gmra.mrb[0].mxu1 %vm291_vm14, %v286_v50 }
 0x1f5   :  { %v269_v52 = vpop.permute.xlu1 %268  ;;  %695 = vmatprep.mubr.msk.f32.mxu1 %vm291_vm14, %v287_v49  ;;  %753 = vmatpush3.bf16.msra.mxu1 %v750_v57 }
 0x1f6   :  { %v283_v53 = vsel %vm279_vm12, %v278_v51, %v269_v52  ;;  %756 = vmatprep.subr.msk.bf16.mxu1 %vm755_vm0, %v754_v63 }
 0x1f7   :  { %v288_v54 = vsel %vm284_vm13, %v283_v53, 1.0 }
 0x1f8   :  { %696 = vmatmul.mubr.msk.f32.gmra.mrb[2].mxu1 %vm291_vm14, %v288_v54 }
 0x1f9   :  { %759 = vmatpush3.bf16.msk.msra.mxu1 %vm755_vm0, %v754_v63 }
 0x2c7   :  { %v694_v58 = vpop.f32.mrb[0].mxu1 }
 0x2c8   :  { %v394_v61 = vmax.f32 %v694_v58, 0.0  ;;  %v374_v62 = vpop.f32.mrb[1].mxu1 }
 0x2c9   :  { %v393_v0 = vmax.f32 %v374_v62, 0.0 }
 0x2ca   :  { %v402_v1 = vrot.slane %v394_v61, 1  ;;  %v421_v7 = vrot.slane %v394_v61, 2 }
 0x2cb   :  { %v401_v2 = vrot.slane %v393_v0, 1  ;;  %v697_v4 = vpop.f32.mrb[2].mxu1  ;;  %v420_v8 = vrot.slane %v393_v0, 2 }
 0x2cc   :  { %v396_v5 = vmax.f32 %v697_v4, 0.0  ;;  %v384_v6 = vpop.f32.mrb[3].mxu1 }
 0x2cd   :  { %v395_v9 = vmax.f32 %v384_v6, 0.0  ;;  %v403_v10 = vsel %vm63_vm4, %v401_v2, %v402_v1  ;;  %v422_v12 = vsel %vm103_vm7, %v420_v8, %v421_v7 }
 0x2ce   :  { %408 = vrot.lane.b32.xlu0 %v403_v10, %s797_s25  ;;  %v406_v3 = vrot.slane %v396_v5, 1  ;;  %v425_v15 = vrot.slane %v396_v5, 2 }
 0x2cf   :  { %v404_v11 = vrot.slane %v395_v9, 1  ;;  %v423_v13 = vrot.slane %v395_v9, 2 }
 0x2d0   :  { %414 = vrot.lane.b32.xlu1 %v406_v3, %s797_s25 }
 0x2d1   :  { %v405_v14 = vsel %vm63_vm4, %v402_v1, %v404_v11  ;;  %v407_v16 = vsel %vm63_vm4, %v404_v11, %v406_v3  ;;  %v424_v17 = vsel %vm103_vm7, %v421_v7, %v423_v13  ;;  %v426_v18 = vsel %vm103_vm7, %v423_v13, %v425_v15 }
 0x2d2   :  { %427 = vrot.lane.b32.xlu0 %v422_v12, %s798_s1  ;;  %vm564_vm4 = vcmask 91136  }
 0x2d4   :  { %410 = vrot.lane.b32.xlu1 %v405_v14, %s797_s25 }
 0x2d6   :  { %412 = vrot.lane.b32.xlu0 %v407_v16, %s797_s25 }
 0x2d8   :  { %429 = vrot.lane.b32.xlu1 %v424_v17, %s798_s1 }
 0x2da   :  { %431 = vrot.lane.b32.xlu0 %v426_v18, %s798_s1 }
 0x2dc   :  { %433 = vrot.lane.b32.xlu1 %v425_v15, %s798_s1 }
 0x340   :  { %v409_v19 = vpop.permute.xlu0 %408 }
 0x341   :  { %v439_v21 = vsel %vm279_vm12, %v393_v0, %v409_v19 }
 0x342   :  { %v415_v20 = vpop.permute.xlu1 %414 }
 0x343   :  { %v442_v34 = vsel %vm279_vm12, %v396_v5, %v415_v20 }
 0x344   :  { %v428_v22 = vpop.permute.xlu0 %427 }
 0x345   :  { %v444_v23 = vsel %vm443_vm1, %v439_v21, %v428_v22 }
 0x346   :  { %v449_v24 = vsel %vm448_vm2, %v444_v23, 1.0  ;;  %v411_v25 = vpop.permute.xlu1 %410 }
 0x347   :  { %706 = vmatprep.mubr.msk.f32.mxu1 %vm457_vm3, %v449_v24  ;;  %v440_v27 = vsel %vm279_vm12, %v394_v61, %v411_v25 }
 0x348   :  { %v413_v26 = vpop.permute.xlu0 %412 }
 0x349   :  { %v441_v30 = vsel %vm279_vm12, %v395_v9, %v413_v26 }
 0x34a   :  { %v430_v28 = vpop.permute.xlu1 %429 }
 0x34b   :  { %v445_v29 = vsel %vm443_vm1, %v440_v27, %v430_v28 }
 0x34c   :  { %v450_v31 = vsel %vm448_vm2, %v445_v29, 1.0  ;;  %v432_v32 = vpop.permute.xlu0 %431 }
 0x34d   :  { %v446_v33 = vsel %vm443_vm1, %v441_v30, %v432_v32  ;;  %707 = vmatmul.mubr.msk.f32.vlgmr.msra.gmra.mrb[4].mxu1 %vm457_vm3, %v450_v31 }
 0x34e   :  { %v451_v35 = vsel %vm448_vm2, %v446_v33, 1.0  ;;  %v434_v36 = vpop.permute.xlu1 %433 }
 0x34f   :  { %v447_v37 = vsel %vm443_vm1, %v442_v34, %v434_v36  ;;  %709 = vmatprep.mubr.msk.f32.mxu1 %vm457_vm3, %v451_v35 }
 0x350   :  { %v452_v38 = vsel %vm448_vm2, %v447_v37, 1.0 }
 0x351   :  { %710 = vmatmul.mubr.msk.f32.gmra.mrb[6].mxu1 %vm457_vm3, %v452_v38 }
 0x420   :  { %v708_v39 = vpop.f32.mrb[4].mxu1 }
 0x421   :  { %v560_v40 = vmax.f32 %v708_v39, 0.0  ;;  %v540_v41 = vpop.f32.mrb[5].mxu1 }
 0x422   :  { %v559_v42 = vmax.f32 %v540_v41, 0.0 }
 0x423   :  { %v565_v43 = vsel %vm564_vm4, %v560_v40, -inf }
 0x424   :  { %v563_v44 = vsel %vm284_vm13, %v559_v42, -inf  ;;  %v711_v45 = vpop.f32.mrb[6].mxu1 }
 0x425   :  { %v566_v46 = vmax.f32 %v563_v44, %v565_v43  ;;  %v562_v47 = vmax.f32 %v711_v45, 0.0  ;;  %v550_v48 = vpop.f32.mrb[7].mxu1 }
 0x426   :  { %v561_v49 = vmax.f32 %v550_v48, 0.0 }
 0x427   :  { %v567_v50 = vrot.slane %v566_v46, 4  ;;  %v574_v51 = vsel %vm564_vm4, %v562_v47, -inf }
 0x428   :  { %v573_v52 = vsel %vm284_vm13, %v561_v49, -inf }
 0x429   :  { %v568_v53 = vmax.f32 %v566_v46, %v567_v50  ;;  %v575_v54 = vmax.f32 %v573_v52, %v574_v51 }
 0x42b   :  { %v569_v55 = vrot.slane %v568_v53, 2  ;;  %v576_v56 = vrot.slane %v575_v54, 4 }
 0x42d   :  { %v570_v57 = vmax.f32 %v568_v53, %v569_v55  ;;  %v577_v58 = vmax.f32 %v575_v54, %v576_v56 }
 0x42f   :  { %v578_v59 = vrot.slane %v577_v58, 2  ;;  %v571_v61 = vrot.slane %v570_v57, 1 }
 0x431   :  { %v579_v60 = vmax.f32 %v577_v58, %v578_v59  ;;  %v572_v63 = vmax.f32 %v570_v57, %v571_v61 }
 0x433   :  { %v580_v62 = vrot.slane %v579_v60, 1 }
 0x435   :  { %v581_v0 = vmax.f32 %v579_v60, %v580_v62 }
 0x437   :  { %v582_v1 = vsel %vm470_vm15, %v572_v63, %v581_v0 }
 0x438   :  { %583 = vst.msk [vmem:[#allocation2] sm:$0x3] %vm564_vm4, %v582_v1 }
 0x439   :  { %780 = shalt.err (!%p777_p4)
}
 0x43a   :  { %s781_s10 = scalar_lea.hbm %s1007_s2, 32 }
 0x43b   :  { %p782_p5 = scmp.ne.s32.totalorder %s1007_s2, %s781_s10  ;;  %p785_p6 = scmp.lt.u32.totalorder %s781_s10, %s1007_s2 }
 0x43d   :  { %p787_p7 = pnand %p785_p6, %p782_p5 }
 0x43f   :  { %790 = shalt.err (!%p787_p7)
}
 0x440   :  { %593 = dma.vmem_to_hbm [thread:$0]  %s591_s0, 32, %s1007_s2, [#allocation3]  }
 0x441   :  { %791 = dma.done.wait [#allocation3], 32  }
 0x442   :  { %792 = vsyncadd [#allocation3], 4294967264 }
 0x443   :  { %597 = vsyncpa [#allocation3], 1 }

</bundles_post_ra>
